<compile_context>
chip_gen: v6e
topology: v6e:2x2x1
jax: 0.10.0
libtpu: 0.0.40
codegen_flags: <defaults>
</compile_context>

<pallas_src>
import jax
import jax.numpy as jnp
from jax.experimental import pallas as pl
from jax.experimental.pallas import tpu as pltpu

_LANES = 128
_MAX_BLOCK_BYTES = 4 * 1024 * 1024   # per x (and o) buffer; double-buffered in+out
                                     # stays well under v7x's 64 MiB VMEM per TC
_VMEM_LIMIT_BYTES = 48 << 20         # explicit scoped-VMEM limit (v5e default = 16 MiB)


def _normalize_kernel(scale_ref, bias_ref, x_ref, o_ref):
    # x_ref / o_ref: (1, C, rows, lanes) VMEM block.
    # scale_ref / bias_ref: (C,) f32 in SMEM with scale = 1/std, bias = -mean/std.
    # Static Python loop over the tiny channel axis -> one scale+bias per channel.
    C = x_ref.shape[1]
    for c in range(C):
        xc = x_ref[0, c].astype(jnp.float32)
        o_ref[0, c] = (xc * scale_ref[c] + bias_ref[c]).astype(o_ref.dtype)


def normalize(x, mean, std):
    assert jnp.issubdtype(x.dtype, jnp.floating), "Normalize expects float input"
    N, C, H, W = x.shape
    assert mean.shape == (C,) and std.shape == (C,)

    scale = 1.0 / std.astype(jnp.float32)          # 1/std
    bias = (-mean.astype(jnp.float32)) * scale     # -mean/std

    hw = H * W
    itemsize = jnp.dtype(x.dtype).itemsize
    sublane = 8 if itemsize >= 4 else (32 // itemsize)   # 8 for f32, 16 for bf16
    cost = pl.CostEstimate(flops=2 * x.size, transcendentals=0,
                           bytes_accessed=2 * x.size * itemsize)

    def _params(sem):
        return pltpu.CompilerParams(dimension_semantics=sem,
                                    vmem_limit_bytes=_VMEM_LIMIT_BYTES)

    if hw % _LANES == 0:
        # Lane-dense fast path: view each image as (C, rows, 128).
        rows = hw // _LANES
        # Largest sublane-aligned row count (C channels folded in) under the byte cap.
        max_rows = max(sublane,
                       (_MAX_BLOCK_BYTES // (C * _LANES * itemsize)) // sublane * sublane)
        if rows <= max_rows:
            block_rows, n_s = rows, 1
        else:
            n_s = pl.cdiv(rows, max_rows)
            block_rows = ((pl.cdiv(rows, n_s) + sublane - 1) // sublane) * sublane
            n_s = pl.cdiv(rows, block_rows)
        # Keep >= 2 parallel grid steps when cheaply possible (v7x has 2 TensorCores).
        if N * n_s < 2 and rows % sublane == 0 and rows >= 2 * sublane:
            block_rows = ((pl.cdiv(rows, 2) + sublane - 1) // sublane) * sublane
            n_s = pl.cdiv(rows, block_rows)

        x4 = x.reshape(N, C, rows, _LANES)
        out = pl.pallas_call(
            _normalize_kernel,
            out_shape=jax.ShapeDtypeStruct(x4.shape, x.dtype),
            grid=(N, n_s),
            in_specs=[
                pl.BlockSpec(memory_space=pltpu.SMEM),      # scale (C,)
                pl.BlockSpec(memory_space=pltpu.SMEM),      # bias  (C,)
                pl.BlockSpec((1, C, block_rows, _LANES),
                             lambda n, s: (n, 0, s, 0)),
            ],
            out_specs=pl.BlockSpec((1, C, block_rows, _LANES),
                                   lambda n, s: (n, 0, s, 0)),
            compiler_params=_params(("parallel", "parallel")),
            cost_estimate=cost,
        )(scale, bias, x4)
        return out.reshape(N, C, H, W)

    # Fallback for H*W not a multiple of 128: flatten spatial to one lane-dense
    # last dim so only the final vreg is lane-masked (not every W-wide row).
    x3 = x.reshape(N, C, 1, hw)
    out = pl.pallas_call(
        _normalize_kernel,
        out_shape=jax.ShapeDtypeStruct(x3.shape, x.dtype),
        grid=(N,),
        in_specs=[
            pl.BlockSpec(memory_space=pltpu.SMEM),          # scale (C,)
            pl.BlockSpec(memory_space=pltpu.SMEM),          # bias  (C,)
            pl.BlockSpec((1, C, 1, hw), lambda n: (n, 0, 0, 0)),
        ],
        out_specs=pl.BlockSpec((1, C, 1, hw), lambda n: (n, 0, 0, 0)),
        compiler_params=_params(("parallel",)),
        cost_estimate=cost,
    )(scale, bias, x3)
    return out.reshape(N, C, H, W)


if __name__ == "__main__":
    key = jax.random.PRNGKey(0)

    # Deterministic "buffers" (standard ImageNet normalization constants).
    mean = jnp.array([0.485, 0.456, 0.406], dtype=jnp.float32)
    std = jnp.array([0.229, 0.224, 0.225], dtype=jnp.float32)

    # NCHW input: batch=2, channels=3 (required by the module's (1,3,1,1)
    # reshape), 16x16 spatial -> flattened spatial = 256 = 2 x 128 lanes.
    x = jax.random.normal(key, (2, 3, 16, 16), dtype=jnp.float32)

    out = normalize(x, mean, std)
    out = jax.block_until_ready(out)

    ref = (x - mean.reshape(1, 3, 1, 1)) / std.reshape(1, 3, 1, 1)
    assert out.shape == x.shape and out.dtype == x.dtype
    assert jnp.allclose(out, ref, atol=1e-6, rtol=1e-5)

    # Exercise the non-lane-dense fallback (H*W = 100, not a multiple of 128).
    x_odd = jax.random.normal(jax.random.PRNGKey(1), (2, 3, 10, 10), dtype=jnp.float32)
    out_odd = jax.block_until_ready(normalize(x_odd, mean, std))
    ref_odd = (x_odd - mean.reshape(1, 3, 1, 1)) / std.reshape(1, 3, 1, 1)
    assert jnp.allclose(out_odd, ref_odd, atol=1e-6, rtol=1e-5)

    print("KERNEL_OK")
</pallas_src>

<mosaic_0001>
module attributes {stable_mosaic.version = 11 : i64} {
  func.func @_normalize_kernel(%arg0: i32, %arg1: i32, %arg2: memref<3xf32, #tpu.memory_space<smem>>, %arg3: memref<3xf32, #tpu.memory_space<smem>>, %arg4: memref<1x3x2x128xf32, #tpu.memory_space<vmem>>, %arg5: memref<1x3x2x128xf32, #tpu.memory_space<vmem>>) attributes {dimension_semantics = [#tpu.dimension_semantics<parallel>, #tpu.dimension_semantics<parallel>], iteration_bounds = array<i64: 2, 1>, scalar_prefetch = 0 : i64, scratch_operands = 0 : i64, tpu.core_type = #tpu.core_type<tc>, window_params = [{transform_indices = @transform_0, window_bounds = array<i64: 3>}, {transform_indices = @transform_1, window_bounds = array<i64: 3>}, {transform_indices = @transform_2, window_bounds = array<i64: 1, 3, 2, 128>}, {transform_indices = @transform_3, window_bounds = array<i64: 1, 3, 2, 128>}]} {
    %c0 = arith.constant 0 : index
    %c0_0 = arith.constant 0 : index
    %c0_1 = arith.constant 0 : index
    %c0_2 = arith.constant 0 : index
    %0 = vector.load %arg4[%c0, %c0_0, %c0_1, %c0_2] : memref<1x3x2x128xf32, #tpu.memory_space<vmem>>, vector<1x1x2x128xf32>
    %1 = vector.shape_cast %0 : vector<1x1x2x128xf32> to vector<2x128xf32>
    %c0_3 = arith.constant 0 : index
    %2 = memref.load %arg2[%c0_3] : memref<3xf32, #tpu.memory_space<smem>>
    %3 = vector.broadcast %2 : f32 to vector<2x128xf32>
    %4 = arith.mulf %1, %3 : vector<2x128xf32>
    %c0_4 = arith.constant 0 : index
    %5 = memref.load %arg3[%c0_4] : memref<3xf32, #tpu.memory_space<smem>>
    %6 = vector.broadcast %5 : f32 to vector<2x128xf32>
    %7 = arith.addf %4, %6 : vector<2x128xf32>
    %c0_5 = arith.constant 0 : index
    %c0_6 = arith.constant 0 : index
    %c0_7 = arith.constant 0 : index
    %c0_8 = arith.constant 0 : index
    %8 = vector.load %arg5[%c0_5, %c0_6, %c0_7, %c0_8] : memref<1x3x2x128xf32, #tpu.memory_space<vmem>>, vector<1x1x2x128xf32>
    %9 = vector.shape_cast %8 : vector<1x1x2x128xf32> to vector<2x128xf32>
    %10 = vector.shape_cast %7 : vector<2x128xf32> to vector<1x1x2x128xf32>
    tpu.vector_store %arg5[%c0_5, %c0_6, %c0_7, %c0_8], %10 {strides = array<i32>} : memref<1x3x2x128xf32, #tpu.memory_space<vmem>>, vector<1x1x2x128xf32>,
    %c0_9 = arith.constant 0 : index
    %c1 = arith.constant 1 : index
    %c0_10 = arith.constant 0 : index
    %c0_11 = arith.constant 0 : index
    %11 = vector.load %arg4[%c0_9, %c1, %c0_10, %c0_11] : memref<1x3x2x128xf32, #tpu.memory_space<vmem>>, vector<1x1x2x128xf32>
    %12 = vector.shape_cast %11 : vector<1x1x2x128xf32> to vector<2x128xf32>
    %c1_12 = arith.constant 1 : index
    %13 = memref.load %arg2[%c1_12] : memref<3xf32, #tpu.memory_space<smem>>
    %14 = vector.broadcast %13 : f32 to vector<2x128xf32>
    %15 = arith.mulf %12, %14 : vector<2x128xf32>
    %c1_13 = arith.constant 1 : index
    %16 = memref.load %arg3[%c1_13] : memref<3xf32, #tpu.memory_space<smem>>
    %17 = vector.broadcast %16 : f32 to vector<2x128xf32>
    %18 = arith.addf %15, %17 : vector<2x128xf32>
    %c0_14 = arith.constant 0 : index
    %c1_15 = arith.constant 1 : index
    %c0_16 = arith.constant 0 : index
    %c0_17 = arith.constant 0 : index
    %19 = vector.load %arg5[%c0_14, %c1_15, %c0_16, %c0_17] : memref<1x3x2x128xf32, #tpu.memory_space<vmem>>, vector<1x1x2x128xf32>
    %20 = vector.shape_cast %19 : vector<1x1x2x128xf32> to vector<2x128xf32>
    %21 = vector.shape_cast %18 : vector<2x128xf32> to vector<1x1x2x128xf32>
    tpu.vector_store %arg5[%c0_14, %c1_15, %c0_16, %c0_17], %21 {strides = array<i32>} : memref<1x3x2x128xf32, #tpu.memory_space<vmem>>, vector<1x1x2x128xf32>,
    %c0_18 = arith.constant 0 : index
    %c2 = arith.constant 2 : index
    %c0_19 = arith.constant 0 : index
    %c0_20 = arith.constant 0 : index
    %22 = vector.load %arg4[%c0_18, %c2, %c0_19, %c0_20] : memref<1x3x2x128xf32, #tpu.memory_space<vmem>>, vector<1x1x2x128xf32>
    %23 = vector.shape_cast %22 : vector<1x1x2x128xf32> to vector<2x128xf32>
    %c2_21 = arith.constant 2 : index
    %24 = memref.load %arg2[%c2_21] : memref<3xf32, #tpu.memory_space<smem>>
    %25 = vector.broadcast %24 : f32 to vector<2x128xf32>
    %26 = arith.mulf %23, %25 : vector<2x128xf32>
    %c2_22 = arith.constant 2 : index
    %27 = memref.load %arg3[%c2_22] : memref<3xf32, #tpu.memory_space<smem>>
    %28 = vector.broadcast %27 : f32 to vector<2x128xf32>
    %29 = arith.addf %26, %28 : vector<2x128xf32>
    %c0_23 = arith.constant 0 : index
    %c2_24 = arith.constant 2 : index
    %c0_25 = arith.constant 0 : index
    %c0_26 = arith.constant 0 : index
    %30 = vector.load %arg5[%c0_23, %c2_24, %c0_25, %c0_26] : memref<1x3x2x128xf32, #tpu.memory_space<vmem>>, vector<1x1x2x128xf32>
    %31 = vector.shape_cast %30 : vector<1x1x2x128xf32> to vector<2x128xf32>
    %32 = vector.shape_cast %29 : vector<2x128xf32> to vector<1x1x2x128xf32>
    tpu.vector_store %arg5[%c0_23, %c2_24, %c0_25, %c0_26], %32 {strides = array<i32>} : memref<1x3x2x128xf32, #tpu.memory_space<vmem>>, vector<1x1x2x128xf32>,
    return
  }
  func.func @transform_0(%arg0: i32, %arg1: i32) -> i32 {
    %c0_i32 = arith.constant 0 : i32
    %c0_i32_0 = arith.constant 0 : i32
    return %c0_i32 : i32
  }
  func.func @transform_1(%arg0: i32, %arg1: i32) -> i32 {
    %c0_i32 = arith.constant 0 : i32
    %c0_i32_0 = arith.constant 0 : i32
    return %c0_i32 : i32
  }
  func.func @transform_2(%arg0: i32, %arg1: i32) -> (i32, i32, i32, i32) {
    %c0_i32 = arith.constant 0 : i32
    %c0_i32_0 = arith.constant 0 : i32
    %c0_i32_1 = arith.constant 0 : i32
    return %arg0, %c0_i32, %arg1, %c0_i32_0 : i32, i32, i32, i32
  }
  func.func @transform_3(%arg0: i32, %arg1: i32) -> (i32, i32, i32, i32) {
    %c0_i32 = arith.constant 0 : i32
    %c0_i32_0 = arith.constant 0 : i32
    %c0_i32_1 = arith.constant 0 : i32
    return %arg0, %c0_i32, %arg1, %c0_i32_0 : i32, i32, i32, i32
  }
}

</mosaic_0001>

<bundles_post_ra>
// kernel: tpu_custom_call.1
= control target key start
LH: loop header
LB: loop body
LE: loop exit
PB: predicated region body
PF: predicated region fallthrough
CT: control target
= control target key end

     0   :  { %s847_s0 = inlined_call_operand.hbm [shape: f32[3], index: 0, kind: input, shape index: {}]   ;;  %s848_s1 = inlined_call_operand.vmem [shape: f32[3], index: 1, kind: input, shape index: {}]   ;;  %s849_s2 = inlined_call_operand.hbm [shape: f32[2,3,2,128], index: 2, kind: input, shape index: {}]   ;;  %s850_s3 = inlined_call_operand.hbm [shape: f32[2,3,2,128], index: 3, kind: output, shape index: {}]  }
   0x1   :  { %852 = sst [smem:[#allocation14_spill]] %s847_s0 }
   0x2   :  { %8 = vsyncpa [#allocation5], 0 }
   0x3   :  { %9 = vsyncpa [#allocation6], 0 }
   0x4   :  { %10 = vsyncpa [#allocation3], 0 }
   0x5   :  { %12 = vsyncpa [#allocation3 + $0x1], 0 }
   0x6   :  { %13 = vsyncpa [#allocation4], 0 }
   0x7   :  { %15 = vsyncpa [#allocation4 + $0x1], 0  ;;  %s667_s12 = smov 0   ;;  %s669_s13 = smov 0  }
   0x8   :  { %s671_s14 = smov 0   ;;  %s673_s15 = smov 0  }
   0x9   :  { %s675_s16 = smov 0   ;;  %s677_s17 = smov 0  }
   0xa LB: > { %s383_s18 = sadd.s32 4294967295, %s637_s17   ;;  %s384_s19 = sadd.s32 4294967294, %s637_s17   ;;  %s637_s17 = sphi %s677_s17, %s21_s17   ;;  %s633_s16 = sphi %s675_s16, %s868_s16   ;;  %s629_s15 = sphi %s673_s15, %s867_s15   ;;  %s625_s14 = sphi %s671_s14, %s866_s14   ;;  %s621_s13 = sphi %s669_s13, %s865_s13   ;;  %s617_s12 = sphi %s667_s12, %s864_s12  }
   0xb   : > { %s84_s20 = sadd.s32 1, %s625_s14  ;;  %p91_p0 = scmp.ne.s32.totalorder %s625_s14, %s621_s13 }
   0xc   : > { %p92_p1 = scmp.eq.s32.totalorder %s637_s17, 0  ;;  %p97_p2 = scmp.ne.s32.totalorder %s621_s13, %s617_s12 }
   0xd   : > { %p705_p3 = scmp.eq.s32.totalorder %s383_s18, 0  ;;  %p123_p4 = scmp.eq.s32.totalorder %s383_s18, 1 }
   0xe   : > { %p93_p5 = por %p92_p1, %p91_p0  ;;  %p129_p6 = scmp.eq.s32.totalorder %s384_s19, 1 }
   0xf   : > { %p711_p7 = por %p705_p3, %p97_p2  ;;  %p715_p8 = por %p123_p4, %p91_p0 }
  0x10   : > { %p719_p9 = por %p129_p6, %p97_p2  ;;  %p385_p10 = scmp.ge.s32.totalorder %s637_s17, 1 }
  0x11   : > { %s855_s23 = scalar_select %p715_p8, 1, 0 }
  0x12   : > { %s856_s24 = scalar_select %p719_p9, 1, 0 }
  0x13   : > { %p136_p11 = scmp.lt.s32.totalorder %s637_s17, 3  ;;  %p437_p1 = scmp.lt.s32.totalorder %s637_s17, 2 }
  0x14   : > { %s158_s28 = sshll.u32 %s848_s1, 4  ;;  %s169_s4 = sand.u32 1, %s625_s14   ;;  %s159_s28 = int_to_ptr.vmem [resolvable:$true] %s158_s28 }
  0x15   : > { %p726_p13 = pnand %p385_p10, %p136_p11  ;;  %p736_p4 = pnand %p437_p1, %p93_p5 }
  0x16   : > { %s33_s5 = sadd.s32 1, %s633_s16  ;;  %s639_s6 = smov [#allocation2]  }
  0x17   : > { %p420_p0 = pneg %p726_p13  ;;  %s860_s0 = sld [smem:[#allocation14_spill]] }
  0x18   : > { %s506_s9 = scalar_lea.vmem %s159_s28, 16  ;;  %p514_p1 = scmp.lt.s32.totalorder %s159_s28, %s159_s28 }
  0x19   : > { %p742_p2 = pnand %p420_p0, %p705_p3  ;;  %p507_p5 = scmp.ne.s32.totalorder %s159_s28, %s506_s9 }
  0x1a   : > { %p515_p0 = scmp.lt.s32.totalorder %s506_s9, %s506_s9 }
  0x1b   : > { %p508_p6 = pneg %p742_p2 }
  0x1c   : > { %p516_p12 = por %p515_p0, %p514_p1 }
  0x1d   : > { %423 = dma.hbm_to_smem (!%p742_p2), %s860_s0, 16, %s639_s6, [#allocation5]  }
  0x1e   : > { %p509_p10 = pnand %p508_p6, %p507_p5 }
  0x20   : > { %p510_p11 = pneg %p509_p10 }
  0x22   : > { %p517_p9 = pnand %p516_p12, %p510_p11 }
  0x24   : > { %520 = shalt.err (!%p517_p9)
}
  0x25   : > { %s640_s10 = smov [#allocation7]   ;;  %p35_p8 = scmp.ge.s32.totalorder %s33_s5, 2 }
  0x26   : > { %426 = dma.vmem_to_smem (!%p742_p2), %s159_s28, 16, %s640_s10, [#allocation6]  }
  0x27   : > { %s404_s11 = smul.u32 6, %s169_s4  ;;  %s870_s5 = smov (%p35_p8, %s33_s5), 0 }
  0x28   : > { %s405_s18 = smul.u32 96, %s633_s16  ;;  %s79_s19 = ssub.s32 %s633_s16, %s870_s5 }
  0x29   : > { %s173_s26 = scalar_lea.vmem [#allocation8], %s404_s11  ;;  %p82_p12 = scmp.eq.s32.totalorder %s79_s19, 0 }
  0x2a   : > { %s181_s27 = sshll.u32 %s173_s26, 4  ;;  %s180_s30 = scalar_lea.hbm %s849_s2, %s405_s18  ;;  %s182_s27 = int_to_ptr.vmem [resolvable:$true] %s181_s27 }
  0x2b   : > { %s768_s8 = scalar_select %p82_p12, %s625_s14, %s84_s20  }
  0x2c   : > { %s170_s9 = scalar_lea.sflag [#allocation3], %s169_s4  ;;  %p523_p9 = pneg %p736_p4 }
  0x2d   : > { %s534_s28 = scalar_lea.vmem %s182_s27, 96  ;;  %s641_s10 = smov [#allocation8]  }
  0x2e   : > { %p535_p8 = scmp.ne.s32.totalorder %s182_s27, %s534_s28  ;;  %s539_s0 = sshll.u32 %s641_s10, 4  ;;  %s540_s0 = int_to_ptr.vmem [resolvable:$false] %s539_s0 }
  0x2f   : > { %s541_s11 = scalar_lea.vmem %s540_s0, 192  ;;  %p542_p6 = scmp.lt.s32.totalorder %s182_s27, %s540_s0 }
  0x30   : > { %p537_p2 = pnand %p535_p8, %p523_p9  ;;  %p543_p10 = scmp.lt.s32.totalorder %s541_s11, %s534_s28 }
  0x32   : > { %p538_p5 = pneg %p537_p2  ;;  %p544_p11 = por %p543_p10, %p542_p6 }
  0x34   : > { %p545_p1 = pnand %p544_p11, %p538_p5 }
  0x36   : > { %548 = shalt.err (!%p545_p1)
}
  0x37   : > { %s642_s18 = smov 32   ;;  %s643_s20 = smov 2  }
  0x38   : > { %430 = dma.hbm_to_vmem [thread:$0]  (!%p736_p4), %s180_s30, 96, %s182_s27, %s170_s9, %s642_s18, %s642_s18, %s643_s20  }
  0x39   : > { %193 = sbr.rel (%p726_p13) target bundleno = 101 (0x65), region = 32 }
  0x3e   : > { %600 = dma.done.wait (%p705_p3), [#allocation5], 16  }
  0x3f   : > { %602 = vsyncadd (%p705_p3), [#allocation5], 4294967280 }
  0x40   : > { %604 = dma.done.wait (%p705_p3), [#allocation6], 16  }
  0x41   : > { %606 = vsyncadd (%p705_p3), [#allocation6], 4294967280  ;;  %s785_s0 = sand.u32 1, %s621_s13  }
  0x42   : > { %s406_s25 = smul.u32 6, %s785_s0  ;;  %s204_s29 = scalar_lea.sflag [#allocation3], %s785_s0 }
  0x44   : > { %s207_s4 = scalar_lea.vmem [#allocation8], %s406_s25 }
  0x45   : > { %608 = dma.done.wait (%p711_p7), %s204_s29, 96  }
  0x46   : > { %610 = vsyncadd (%p711_p7), %s204_s29, 4294967200 }
  0x47   : > { %212 = sfence }
  0x48   : > { %s232_s19 = sld [smem:[#allocation2]]  ;;  %v231_v0 = vld [vmem:[%s207_s4] sm:$0x3]  ;;  %v393_v2 = vld [vmem:[%s207_s4 + $0x2] sm:$0x3]  ;;  %s230_s30 = scalar_lea.vmem [#allocation9], %s406_s25 }
  0x49   : > { %s235_s26 = sld [smem:[#allocation7]]  ;;  %s274_s9 = sshll.u32 %s230_s30, 4  ;;  %v397_v6 = vld [vmem:[%s207_s4 + $0x4] sm:$0x3]  ;;  %s794_s9 = int_to_ptr.vmem [resolvable:$true] %s274_s9 }
  0x4a   : > { %s394_s27 = sld [smem:[#allocation2 + $0x1]]  ;;  %s407_s22 = smul.u32 96, %s629_s15 }
  0x4b   : > { %s395_s21 = sld [smem:[#allocation7 + $0x1]]  ;;  %s260_s18 = scalar_lea.sflag [#allocation4], %s785_s0 }
  0x4c   : > { %s398_s6 = sld [smem:[#allocation2 + $0x2]]  ;;  %s799_s11 = scalar_lea.hbm %s850_s3, %s407_s22 }
  0x4d   : > { %s399_s7 = sld [smem:[#allocation7 + $0x2]]  ;;  %s549_s15 = scalar_lea.vmem %s794_s9, 96 }
  0x4e   : > { %v233_v1 = vstv %s232_s19  ;;  %p550_p3 = scmp.ne.s32.totalorder %s794_s9, %s549_s15  ;;  %p861_p7 = scmp.ne.s32.totalorder %s855_s23, 0 }
  0x4f   : > { %v234_v3 = vmul.f32 %v233_v1, %v231_v0  ;;  %v236_v4 = vstv %s235_s26  ;;  %s644_s20 = smov [#allocation9]  }
  0x50   : > { %v242_v5 = vstv %s394_s27  ;;  %p551_p13 = pnand %p550_p3, %p861_p7  ;;  %s553_s25 = sshll.u32 %s644_s20, 4  ;;  %s554_s25 = int_to_ptr.vmem [resolvable:$false] %s553_s25 }
  0x51   : > { %v237_v7 = vadd.f32 %v236_v4, %v234_v3  ;;  %v243_v8 = vmul.f32 %v393_v2, %v242_v5  ;;  %v245_v9 = vstv %s395_s21  ;;  %s555_s29 = scalar_lea.vmem %s554_s25, 192  ;;  %p556_p0 = scmp.lt.s32.totalorder %s794_s9, %s554_s25 }
  0x52   : > { %v252_v10 = vstv %s398_s6  ;;  %p552_p4 = pneg %p551_p13  ;;  %p557_p12 = scmp.lt.s32.totalorder %s555_s29, %s549_s15 }
  0x53   : > { %238 = vst [vmem:[%s230_s30] sm:$0x3] %v237_v7  ;;  %v246_v11 = vadd.f32 %v245_v9, %v243_v8  ;;  %v253_v12 = vmul.f32 %v397_v6, %v252_v10  ;;  %v255_v13 = vstv %s399_s7 }
  0x54   : > { %p558_p9 = por %p557_p12, %p556_p0 }
  0x55   : > { %396 = vst [vmem:[%s230_s30 + $0x2] sm:$0x3] %v246_v11  ;;  %v256_v14 = vadd.f32 %v255_v13, %v253_v12 }
  0x56   : > { %p559_p8 = pnand %p558_p9, %p552_p4 }
  0x57   : > { %400 = vst [vmem:[%s230_s30 + $0x4] sm:$0x3] %v256_v14 }
  0x58   : > { %562 = shalt.err (!%p559_p8)
}
  0x59   : > { %s563_s4 = scalar_lea.hbm %s799_s11, 96  ;;  %s567_s27 = scalar_lea.hbm %s850_s3, 192 }
  0x5a   : > { %p564_p2 = scmp.ne.s32.totalorder %s799_s11, %s563_s4  ;;  %p568_p10 = scmp.lt.s32.totalorder %s799_s11, %s850_s3 }
  0x5b   : > { %p569_p11 = scmp.lt.s32.totalorder %s567_s27, %s563_s4 }
  0x5c   : > { %p565_p5 = pnand %p564_p2, %p861_p7 }
  0x5d   : > { %p570_p1 = por %p569_p11, %p568_p10 }
  0x5e   : > { %p566_p6 = pneg %p565_p5 }
  0x60   : > { %p571_p3 = pnand %p570_p1, %p566_p6 }
  0x62   : > { %574 = shalt.err (!%p571_p3)
}
  0x63   : > { %s645_s7 = smov 32   ;;  %s646_s30 = smov 2  }
  0x64   : > { %418 = dma.vmem_to_hbm [thread:$0]  (%p861_p7), %s794_s9, 96, %s799_s11, %s260_s18, %s645_s7, %s645_s7, %s646_s30  }
  0x65 PF: > { %s289_s22 = sand.u32 1, %s617_s12   ;;  %p862_p13 = scmp.ne.s32.totalorder %s856_s24, 0 }
  0x66   : > { %p863_p4 = scmp.ge.s32.totalorder %s637_s17, 2  ;;  %s290_s28 = scalar_lea.sflag [#allocation4], %s289_s22 }
  0x68   : > { %p432_p0 = pnand %p863_p4, %p862_p13 }
  0x6a   : > { %p433_p12 = pneg %p432_p0 }
  0x6c   : > { %612 = dma.done.wait (%p433_p12), %s290_s28, 96  }
  0x6d   : > { %614 = vsyncadd (%p433_p12), %s290_s28, 4294967200  ;;  %s21_s17 = sadd.s32 1, %s637_s17   ;;  %s864_s12 = smov %s621_s13 }
  0x6e   : > { %p18_p9 = scmp.ge.s32.totalorder %s21_s17, 4   ;;  %s865_s13 = smov %s625_s14 }
  0x6f   : > { %s866_s14 = smov %s768_s8  ;;  %s867_s15 = smov %s633_s16 }
  0x70   : > { %s868_s16 = smov %s870_s5  ;;  %20 = sbr.rel (!%p18_p9) target bundleno = 10 (0xa), region = 91 }
  0x75   :  { %295 = vsyncpa [#allocation3], 1 }
  0x76   :  { %297 = vsyncpa [#allocation3 + $0x1], 1 }
  0x77   :  { %298 = vsyncpa [#allocation4], 1 }
  0x78   :  { %300 = vsyncpa [#allocation4 + $0x1], 1 }
  0x79   :  { %301 = vsyncpa [#allocation5], 1 }
  0x7a   :  { %303 = vsyncpa [#allocation5 + $0x1], 1 }
  0x7b   :  { %304 = vsyncpa [#allocation6], 1 }
  0x7c   :  { %306 = vsyncpa [#allocation6 + $0x1], 1 }

</bundles_post_ra>
